<compile_context>
chip_gen: v5e
topology: v5e:2x2
jax: 0.10.0
libtpu: 0.0.40
codegen_flags: <defaults>
</compile_context>

<pallas_src>
import functools
import math

import jax
import jax.numpy as jnp
from jax.experimental import pallas as pl
from jax.experimental.pallas import tpu as pltpu

BN_EPS = 1e-5
LANE = 128

# (out_channels, kernel_size) per conv layer; ('p',) is a 2x2/stride-2 max-pool.
CFG = [(64, 3), (128, 3), (128, 3), (128, 3), (128, 3), (128, 3), ('p',),
       (256, 3), (256, 3), (256, 3), (512, 3), ('p',),
       (2048, 1), (256, 1), (256, 3)]


def _round_up(x, m):
    return (x + m - 1) // m * m


def _pick_tn(cout):
    """Cout tile: lane-dense (>=128) and >=2 tiles whenever possible."""
    for tn in (512, 256, 128):
        if cout % tn == 0 and cout // tn >= 2:
            return tn
    return 128 if cout % 128 == 0 else cout


def _vmem_limit(block_bytes):
    """Explicit VMEM budget: double-buffered blocks + f32 accumulator headroom,
    capped at v7x physical VMEM (64 MiB)."""
    return int(min(64 << 20, max(16 << 20, 4 * block_bytes + (4 << 20))))


# ---------------------------------------------------------------------------
# 3x3 "same" conv + folded-BN bias + ReLU (no im2col: 9 taps accumulated here)
# ---------------------------------------------------------------------------
def _conv3_kernel(x_ref, w_ref, b_ref, o_ref, *, H, W, relu):
    # x_ref: (1, H+2, W+2, Cin) bf16   w_ref: (9, Cin, tn) bf16
    # b_ref: (1, tn) f32               o_ref: (1, H, W, tn) bf16
    tn = w_ref.shape[-1]
    if W % 8 == 0:
        # Flatten the spatial window into one (H*W, Cin) MXU operand per tap.
        acc = jnp.zeros((H * W, tn), jnp.float32)
        for kh in range(3):
            for kw in range(3):
                xs = x_ref[0, kh:kh + H, kw:kw + W, :]
                xs = xs.reshape(H * W, xs.shape[-1])
                acc = acc + jnp.dot(xs, w_ref[kh * 3 + kw],
                                    preferred_element_type=jnp.float32)
        y = acc + b_ref[...]
        if relu:
            y = jnp.maximum(y, 0.0)
        o_ref[...] = y.astype(o_ref.dtype).reshape(1, H, W, tn)
    else:
        # Pool-shrunk spatial sizes: one output row at a time so every operand
        # stays 2-D (no sublane-unaligned reshapes).
        for h in range(H):
            acc = jnp.zeros((W, tn), jnp.float32)
            for kh in range(3):
                for kw in range(3):
                    xs = x_ref[0, h + kh, kw:kw + W, :]
                    acc = acc + jnp.dot(xs, w_ref[kh * 3 + kw],
                                        preferred_element_type=jnp.float32)
            y = acc + b_ref[...]
            if relu:
                y = jnp.maximum(y, 0.0)
            o_ref[0, h] = y.astype(o_ref.dtype)


def conv3x3_bn_relu(x, w, bias, *, relu=True):
    """x: (N, H, W, Cin) bf16, w: (9, Cin, Cout) bf16, bias: (1, Cout) f32."""
    N, H, W, Cin = x.shape
    Cout = w.shape[-1]
    tn = _pick_tn(Cout)
    xp = jnp.pad(x, ((0, 0), (1, 1), (1, 1), (0, 0)))   # zero 'same' padding
    blk_bytes = ((H + 2) * (W + 2) * Cin * 2 + 9 * Cin * tn * 2
                 + tn * 4 + H * W * tn * 2 + H * W * tn * 4)
    kernel = functools.partial(_conv3_kernel, H=H, W=W, relu=relu)
    return pl.pallas_call(
        kernel,
        out_shape=jax.ShapeDtypeStruct((N, H, W, Cout), jnp.bfloat16),
        grid=(N, Cout // tn),
        in_specs=[
            pl.BlockSpec((1, H + 2, W + 2, Cin), lambda n, j: (n, 0, 0, 0)),
            pl.BlockSpec((9, Cin, tn), lambda n, j: (0, 0, j)),
            pl.BlockSpec((1, tn), lambda n, j: (0, j)),
        ],
        out_specs=pl.BlockSpec((1, H, W, tn), lambda n, j: (n, 0, 0, j)),
        compiler_params=pltpu.CompilerParams(
            dimension_semantics=("parallel", "parallel"),
            vmem_limit_bytes=_vmem_limit(blk_bytes)),
    )(xp, w, bias)


# ---------------------------------------------------------------------------
# 1x1 conv (and generic fused matmul): (x @ w) + bias (+ReLU)
# ---------------------------------------------------------------------------
def _matmul_bias_act_kernel(x_ref, w_ref, b_ref, o_ref, *, relu):
    y = jnp.dot(x_ref[...], w_ref[...], preferred_element_type=jnp.float32)
    y = y + b_ref[...]
    if relu:
        y = jnp.maximum(y, 0.0)
    o_ref[...] = y.astype(o_ref.dtype)


def matmul_bias_act(x, w, bias, *, relu=True, out_dtype=jnp.bfloat16):
    """x:(M,K) bf16, w:(K,Cout) bf16, bias:(1,Cout) f32."""
    M, K = x.shape
    Cout = w.shape[-1]
    tn = _pick_tn(Cout)
    tm = 128 if M % 128 == 0 else M         # full-M block at these small sizes
    blk_bytes = tm * K * 2 + K * tn * 2 + tn * 4 + tm * tn * 2 + tm * tn * 4
    kernel = functools.partial(_matmul_bias_act_kernel, relu=relu)
    return pl.pallas_call(
        kernel,
        out_shape=jax.ShapeDtypeStruct((M, Cout), out_dtype),
        grid=(M // tm, Cout // tn),
        in_specs=[
            pl.BlockSpec((tm, K), lambda i, j: (i, 0)),
            pl.BlockSpec((K, tn), lambda i, j: (0, j)),
            pl.BlockSpec((1, tn), lambda i, j: (0, j)),
        ],
        out_specs=pl.BlockSpec((tm, tn), lambda i, j: (i, j)),
        compiler_params=pltpu.CompilerParams(
            dimension_semantics=("parallel", "parallel"),
            vmem_limit_bytes=_vmem_limit(blk_bytes)),
    )(x, w, bias)


# ---------------------------------------------------------------------------
# 2x2 / stride-2 max-pool (NHWC in, NHWC out)
# ---------------------------------------------------------------------------
def _maxpool_kernel(x_ref, o_ref):
    v = x_ref[0]                       # (2, Wo, 2, C)
    v = jnp.max(v, axis=0)             # max over the two pooled rows
    o_ref[0] = jnp.max(v, axis=1)      # max over the two pooled columns


def maxpool2x2(x):
    """x: (N, H, W, C) -> (N, H//2, W//2, C)."""
    N, H, W, C = x.shape
    assert H % 2 == 0 and W % 2 == 0, "odd spatial sizes not supported (PyTorch floors)"
    Ho, Wo = H // 2, W // 2
    x5 = x.reshape(N * Ho, 2, Wo, 2, C)      # free, contiguous reshape (no copy)
    blk_bytes = 2 * Wo * 2 * C * 2 + Wo * C * 2
    out = pl.pallas_call(
        _maxpool_kernel,
        out_shape=jax.ShapeDtypeStruct((N * Ho, Wo, C), x.dtype),
        grid=(N * Ho,),
        in_specs=[pl.BlockSpec((1, 2, Wo, 2, C), lambda i: (i, 0, 0, 0, 0))],
        out_specs=pl.BlockSpec((1, Wo, C), lambda i: (i, 0, 0)),
        compiler_params=pltpu.CompilerParams(
            dimension_semantics=("parallel",),
            vmem_limit_bytes=_vmem_limit(blk_bytes)),
    )(x5)
    return out.reshape(N, Ho, Wo, C)


# ---------------------------------------------------------------------------
# Head: global spatial max-pool fused with the Linear classifier
# ---------------------------------------------------------------------------
def _head_kernel(x_ref, w_ref, b_ref, o_ref):
    pooled = jnp.max(x_ref[...], axis=1)                 # (N, C)
    y = jnp.dot(pooled, w_ref[...], preferred_element_type=jnp.float32)
    o_ref[...] = y + b_ref[...]


def global_maxpool_linear(x, w, b):
    """x: (N, HW, C) bf16, w: (C, ncp) bf16, b: (1, ncp) f32 -> (N, ncp) f32."""
    N, HW, C = x.shape
    ncp = w.shape[-1]
    blk_bytes = N * HW * C * 2 + C * ncp * 2 + ncp * 4 + N * ncp * 4
    return pl.pallas_call(
        _head_kernel,
        out_shape=jax.ShapeDtypeStruct((N, ncp), jnp.float32),
        grid=(1,),
        in_specs=[
            pl.BlockSpec((N, HW, C), lambda i: (0, 0, 0)),
            pl.BlockSpec((C, ncp), lambda i: (0, 0)),
            pl.BlockSpec((1, ncp), lambda i: (0, 0)),
        ],
        out_specs=pl.BlockSpec((N, ncp), lambda i: (0, 0)),
        compiler_params=pltpu.CompilerParams(
            dimension_semantics=("arbitrary",),
            vmem_limit_bytes=_vmem_limit(blk_bytes)),
    )(x, w, b)


# ---------------------------------------------------------------------------
# Parameter init (PyTorch-equivalent) + forward
# ---------------------------------------------------------------------------
def init_params(key, in_chans, num_classes):
    params = []
    cin = in_chans          # true input channels of the next conv
    cin_p = in_chans        # channels actually emitted by the previous layer
    gain = math.sqrt(2.0)   # nn.init.calculate_gain('relu')
    for entry in CFG:
        if entry[0] == 'p':
            params.append(None)
            continue
        cout, k = entry
        cout_p = _round_up(cout, LANE)          # lane-dense output channels
        key, wk, bk = jax.random.split(key, 3)
        fan_in = cin * k * k
        fan_out = cout * k * k
        limit = gain * math.sqrt(6.0 / (fan_in + fan_out))   # xavier_uniform
        w = jax.random.uniform(wk, (k, k, cin, cout), jnp.float32, -limit, limit)
        bound = 1.0 / math.sqrt(fan_in)
        b = jax.random.uniform(bk, (cout,), jnp.float32, -bound, bound)
        # BatchNorm2d (inference): gamma=1, beta=0, running_mean=0, running_var=1.
        gamma = jnp.ones((cout,), jnp.float32)
        beta = jnp.zeros((cout,), jnp.float32)
        mean = jnp.zeros((cout,), jnp.float32)
        var = jnp.ones((cout,), jnp.float32)
        scale = gamma / jnp.sqrt(var + BN_EPS)
        w = w * scale                              # fold BN scale into weights
        bias = (b - mean) * scale + beta           # fold conv bias + BN shift
        # Kernel layout + exact zero-padding of cin -> cin_p, cout -> cout_p.
        if k == 3:
            w = w.reshape(9, cin, cout)
            w = jnp.pad(w, ((0, 0), (0, cin_p - cin), (0, cout_p - cout)))
        else:
            w = w.reshape(cin, cout)
            w = jnp.pad(w, ((0, cin_p - cin), (0, cout_p - cout)))
        bias = jnp.pad(bias, (0, cout_p - cout))
        params.append({'k': k,
                       'w': w.astype(jnp.bfloat16),
                       'bias': bias.reshape(1, cout_p).astype(jnp.float32)})
        cin, cin_p = cout, cout_p
    # Linear classifier (padded to 128 output lanes; sliced back outside).
    key, wk, bk = jax.random.split(key, 3)
    ncp = _round_up(num_classes, LANE)
    bound = 1.0 / math.sqrt(cin)
    cw = jax.random.uniform(wk, (cin, num_classes), jnp.float32, -bound, bound)
    cb = jax.random.uniform(bk, (num_classes,), jnp.float32, -bound, bound)
    cw = jnp.pad(cw, ((0, cin_p - cin), (0, ncp - num_classes))).astype(jnp.bfloat16)
    cb = jnp.pad(cb, (0, ncp - num_classes)).reshape(1, ncp).astype(jnp.float32)
    return params, (cw, cb, num_classes)


def simplenet_forward(x_nchw, params, classifier):
    # PyTorch feeds NCHW; transpose once to NHWC, bf16 activations throughout.
    x = jnp.transpose(x_nchw, (0, 2, 3, 1)).astype(jnp.bfloat16)
    for p in params:
        if p is None:
            x = maxpool2x2(x)
        elif p['k'] == 1:
            N, H, W, C = x.shape
            y = matmul_bias_act(x.reshape(N * H * W, C), p['w'], p['bias'])
            x = y.reshape(N, H, W, -1)
        else:
            x = conv3x3_bn_relu(x, p['w'], p['bias'])
    # F.max_pool2d(out, out.size()[2:]) + Dropout2d(p=0.0) + flatten + Linear
    N, H, W, C = x.shape
    cls_w, cls_b, num_classes = classifier
    logits = global_maxpool_linear(x.reshape(N, H * W, C), cls_w, cls_b)
    return logits[:, :num_classes]


if __name__ == "__main__":
    key = jax.random.PRNGKey(0)
    in_chans, num_classes = 4, 8          # small in_chans for the demo; cfg channels unchanged
    N, H, W = 2, 8, 8
    pkey, xkey = jax.random.split(key)
    params, classifier = init_params(pkey, in_chans, num_classes)
    x = jax.random.normal(xkey, (N, in_chans, H, W), jnp.float32)   # NCHW like PyTorch
    out = simplenet_forward(x, params, classifier)
    out = jax.block_until_ready(out)
    assert out.shape == (N, num_classes) and out.dtype == jnp.float32
    print("KERNEL_OK")
</pallas_src>

<mosaic_0001>
module attributes {stable_mosaic.version = 11 : i64} {
  func.func @_conv3_kernel(%arg0: i32, %arg1: i32, %arg2: memref<1x10x10x4xbf16, #tpu.memory_space<vmem>>, %arg3: memref<9x4x128xbf16, #tpu.memory_space<vmem>>, %arg4: memref<1x128xf32, #tpu.memory_space<vmem>>, %arg5: memref<1x8x8x128xbf16, #tpu.memory_space<vmem>>) attributes {dimension_semantics = [#tpu.dimension_semantics<parallel>, #tpu.dimension_semantics<parallel>], iteration_bounds = array<i64: 2, 1>, scalar_prefetch = 0 : i64, scratch_operands = 0 : i64, tpu.core_type = #tpu.core_type<tc>, window_params = [{transform_indices = @transform_0, window_bounds = array<i64: 1, 10, 10, 4>}, {transform_indices = @transform_1, window_bounds = array<i64: 9, 4, 128>}, {transform_indices = @transform_2, window_bounds = array<i64: 1, 128>}, {transform_indices = @transform_3, window_bounds = array<i64: 1, 8, 8, 128>}]} {
    %cst = arith.constant 0.000000e+00 : f32
    %0 = vector.broadcast %cst : f32 to vector<64x128xf32>
    %c0 = arith.constant 0 : index
    %c0_0 = arith.constant 0 : index
    %c0_1 = arith.constant 0 : index
    %c0_2 = arith.constant 0 : index
    %1 = vector.load %arg2[%c0, %c0_0, %c0_1, %c0_2] : memref<1x10x10x4xbf16, #tpu.memory_space<vmem>>, vector<1x8x8x4xbf16>
    %2 = vector.shape_cast %1 : vector<1x8x8x4xbf16> to vector<8x8x4xbf16>
    %3 = vector.shape_cast %2 : vector<8x8x4xbf16> to vector<64x4xbf16>
    %c0_3 = arith.constant 0 : index
    %c0_4 = arith.constant 0 : index
    %c0_5 = arith.constant 0 : index
    %4 = vector.load %arg3[%c0_3, %c0_4, %c0_5] : memref<9x4x128xbf16, #tpu.memory_space<vmem>>, vector<1x4x128xbf16>
    %5 = vector.shape_cast %4 : vector<1x4x128xbf16> to vector<4x128xbf16>
    %cst_6 = arith.constant dense<0.000000e+00> : vector<64x128xf32>
    %6 = tpu.matmul %3, %5, %cst_6 {dimension_numbers = #tpu.dot_dimension_numbers<[1], [0], [0], [1], [0, 0, 1, 1], [], []>} : vector<64x4xbf16>, vector<4x128xbf16>, vector<64x128xf32> -> vector<64x128xf32>
    %7 = arith.addf %0, %6 : vector<64x128xf32>
    %c0_7 = arith.constant 0 : index
    %c0_8 = arith.constant 0 : index
    %c1 = arith.constant 1 : index
    %c0_9 = arith.constant 0 : index
    %8 = vector.load %arg2[%c0_7, %c0_8, %c1, %c0_9] : memref<1x10x10x4xbf16, #tpu.memory_space<vmem>>, vector<1x8x8x4xbf16>
    %9 = vector.shape_cast %8 : vector<1x8x8x4xbf16> to vector<8x8x4xbf16>
    %10 = vector.shape_cast %9 : vector<8x8x4xbf16> to vector<64x4xbf16>
    %c1_10 = arith.constant 1 : index
    %c0_11 = arith.constant 0 : index
    %c0_12 = arith.constant 0 : index
    %11 = vector.load %arg3[%c1_10, %c0_11, %c0_12] : memref<9x4x128xbf16, #tpu.memory_space<vmem>>, vector<1x4x128xbf16>
    %12 = vector.shape_cast %11 : vector<1x4x128xbf16> to vector<4x128xbf16>
    %cst_13 = arith.constant dense<0.000000e+00> : vector<64x128xf32>
    %13 = tpu.matmul %10, %12, %cst_13 {dimension_numbers = #tpu.dot_dimension_numbers<[1], [0], [0], [1], [0, 0, 1, 1], [], []>} : vector<64x4xbf16>, vector<4x128xbf16>, vector<64x128xf32> -> vector<64x128xf32>
    %14 = arith.addf %7, %13 : vector<64x128xf32>
    %c0_14 = arith.constant 0 : index
    %c0_15 = arith.constant 0 : index
    %c2 = arith.constant 2 : index
    %c0_16 = arith.constant 0 : index
    %15 = vector.load %arg2[%c0_14, %c0_15, %c2, %c0_16] : memref<1x10x10x4xbf16, #tpu.memory_space<vmem>>, vector<1x8x8x4xbf16>
    %16 = vector.shape_cast %15 : vector<1x8x8x4xbf16> to vector<8x8x4xbf16>
    %17 = vector.shape_cast %16 : vector<8x8x4xbf16> to vector<64x4xbf16>
    %c2_17 = arith.constant 2 : index
    %c0_18 = arith.constant 0 : index
    %c0_19 = arith.constant 0 : index
    %18 = vector.load %arg3[%c2_17, %c0_18, %c0_19] : memref<9x4x128xbf16, #tpu.memory_space<vmem>>, vector<1x4x128xbf16>
    %19 = vector.shape_cast %18 : vector<1x4x128xbf16> to vector<4x128xbf16>
    %cst_20 = arith.constant dense<0.000000e+00> : vector<64x128xf32>
    %20 = tpu.matmul %17, %19, %cst_20 {dimension_numbers = #tpu.dot_dimension_numbers<[1], [0], [0], [1], [0, 0, 1, 1], [], []>} : vector<64x4xbf16>, vector<4x128xbf16>, vector<64x128xf32> -> vector<64x128xf32>
    %21 = arith.addf %14, %20 : vector<64x128xf32>
    %c0_21 = arith.constant 0 : index
    %c1_22 = arith.constant 1 : index
    %c0_23 = arith.constant 0 : index
    %c0_24 = arith.constant 0 : index
    %22 = vector.load %arg2[%c0_21, %c1_22, %c0_23, %c0_24] : memref<1x10x10x4xbf16, #tpu.memory_space<vmem>>, vector<1x8x8x4xbf16>
    %23 = vector.shape_cast %22 : vector<1x8x8x4xbf16> to vector<8x8x4xbf16>
    %24 = vector.shape_cast %23 : vector<8x8x4xbf16> to vector<64x4xbf16>
    %c3 = arith.constant 3 : index
    %c0_25 = arith.constant 0 : index
    %c0_26 = arith.constant 0 : index
    %25 = vector.load %arg3[%c3, %c0_25, %c0_26] : memref<9x4x128xbf16, #tpu.memory_space<vmem>>, vector<1x4x128xbf16>
    %26 = vector.shape_cast %25 : vector<1x4x128xbf16> to vector<4x128xbf16>
    %cst_27 = arith.constant dense<0.000000e+00> : vector<64x128xf32>
    %27 = tpu.matmul %24, %26, %cst_27 {dimension_numbers = #tpu.dot_dimension_numbers<[1], [0], [0], [1], [0, 0, 1, 1], [], []>} : vector<64x4xbf16>, vector<4x128xbf16>, vector<64x128xf32> -> vector<64x128xf32>
    %28 = arith.addf %21, %27 : vector<64x128xf32>
    %c0_28 = arith.constant 0 : index
    %c1_29 = arith.constant 1 : index
    %c1_30 = arith.constant 1 : index
    %c0_31 = arith.constant 0 : index
    %29 = vector.load %arg2[%c0_28, %c1_29, %c1_30, %c0_31] : memref<1x10x10x4xbf16, #tpu.memory_space<vmem>>, vector<1x8x8x4xbf16>
    %30 = vector.shape_cast %29 : vector<1x8x8x4xbf16> to vector<8x8x4xbf16>
    %31 = vector.shape_cast %30 : vector<8x8x4xbf16> to vector<64x4xbf16>
    %c4 = arith.constant 4 : index
    %c0_32 = arith.constant 0 : index
    %c0_33 = arith.constant 0 : index
    %32 = vector.load %arg3[%c4, %c0_32, %c0_33] : memref<9x4x128xbf16, #tpu.memory_space<vmem>>, vector<1x4x128xbf16>
    %33 = vector.shape_cast %32 : vector<1x4x128xbf16> to vector<4x128xbf16>
    %cst_34 = arith.constant dense<0.000000e+00> : vector<64x128xf32>
    %34 = tpu.matmul %31, %33, %cst_34 {dimension_numbers = #tpu.dot_dimension_numbers<[1], [0], [0], [1], [0, 0, 1, 1], [], []>} : vector<64x4xbf16>, vector<4x128xbf16>, vector<64x128xf32> -> vector<64x128xf32>
    %35 = arith.addf %28, %34 : vector<64x128xf32>
    %c0_35 = arith.constant 0 : index
    %c1_36 = arith.constant 1 : index
    %c2_37 = arith.constant 2 : index
    %c0_38 = arith.constant 0 : index
    %36 = vector.load %arg2[%c0_35, %c1_36, %c2_37, %c0_38] : memref<1x10x10x4xbf16, #tpu.memory_space<vmem>>, vector<1x8x8x4xbf16>
    %37 = vector.shape_cast %36 : vector<1x8x8x4xbf16> to vector<8x8x4xbf16>
    %38 = vector.shape_cast %37 : vector<8x8x4xbf16> to vector<64x4xbf16>
    %c5 = arith.constant 5 : index
    %c0_39 = arith.constant 0 : index
    %c0_40 = arith.constant 0 : index
    %39 = vector.load %arg3[%c5, %c0_39, %c0_40] : memref<9x4x128xbf16, #tpu.memory_space<vmem>>, vector<1x4x128xbf16>
    %40 = vector.shape_cast %39 : vector<1x4x128xbf16> to vector<4x128xbf16>
    %cst_41 = arith.constant dense<0.000000e+00> : vector<64x128xf32>
    %41 = tpu.matmul %38, %40, %cst_41 {dimension_numbers = #tpu.dot_dimension_numbers<[1], [0], [0], [1], [0, 0, 1, 1], [], []>} : vector<64x4xbf16>, vector<4x128xbf16>, vector<64x128xf32> -> vector<64x128xf32>
    %42 = arith.addf %35, %41 : vector<64x128xf32>
    %c0_42 = arith.constant 0 : index
    %c2_43 = arith.constant 2 : index
    %c0_44 = arith.constant 0 : index
    %c0_45 = arith.constant 0 : index
    %43 = vector.load %arg2[%c0_42, %c2_43, %c0_44, %c0_45] : memref<1x10x10x4xbf16, #tpu.memory_space<vmem>>, vector<1x8x8x4xbf16>
    %44 = vector.shape_cast %43 : vector<1x8x8x4xbf16> to vector<8x8x4xbf16>
    %45 = vector.shape_cast %44 : vector<8x8x4xbf16> to vector<64x4xbf16>
    %c6 = arith.constant 6 : index
    %c0_46 = arith.constant 0 : index
    %c0_47 = arith.constant 0 : index
    %46 = vector.load %arg3[%c6, %c0_46, %c0_47] : memref<9x4x128xbf16, #tpu.memory_space<vmem>>, vector<1x4x128xbf16>
    %47 = vector.shape_cast %46 : vector<1x4x128xbf16> to vector<4x128xbf16>
    %cst_48 = arith.constant dense<0.000000e+00> : vector<64x128xf32>
    %48 = tpu.matmul %45, %47, %cst_48 {dimension_numbers = #tpu.dot_dimension_numbers<[1], [0], [0], [1], [0, 0, 1, 1], [], []>} : vector<64x4xbf16>, vector<4x128xbf16>, vector<64x128xf32> -> vector<64x128xf32>
    %49 = arith.addf %42, %48 : vector<64x128xf32>
    %c0_49 = arith.constant 0 : index
    %c2_50 = arith.constant 2 : index
    %c1_51 = arith.constant 1 : index
    %c0_52 = arith.constant 0 : index
    %50 = vector.load %arg2[%c0_49, %c2_50, %c1_51, %c0_52] : memref<1x10x10x4xbf16, #tpu.memory_space<vmem>>, vector<1x8x8x4xbf16>
    %51 = vector.shape_cast %50 : vector<1x8x8x4xbf16> to vector<8x8x4xbf16>
    %52 = vector.shape_cast %51 : vector<8x8x4xbf16> to vector<64x4xbf16>
    %c7 = arith.constant 7 : index
    %c0_53 = arith.constant 0 : index
    %c0_54 = arith.constant 0 : index
    %53 = vector.load %arg3[%c7, %c0_53, %c0_54] : memref<9x4x128xbf16, #tpu.memory_space<vmem>>, vector<1x4x128xbf16>
    %54 = vector.shape_cast %53 : vector<1x4x128xbf16> to vector<4x128xbf16>
    %cst_55 = arith.constant dense<0.000000e+00> : vector<64x128xf32>
    %55 = tpu.matmul %52, %54, %cst_55 {dimension_numbers = #tpu.dot_dimension_numbers<[1], [0], [0], [1], [0, 0, 1, 1], [], []>} : vector<64x4xbf16>, vector<4x128xbf16>, vector<64x128xf32> -> vector<64x128xf32>
    %56 = arith.addf %49, %55 : vector<64x128xf32>
    %c0_56 = arith.constant 0 : index
    %c2_57 = arith.constant 2 : index
    %c2_58 = arith.constant 2 : index
    %c0_59 = arith.constant 0 : index
    %57 = vector.load %arg2[%c0_56, %c2_57, %c2_58, %c0_59] : memref<1x10x10x4xbf16, #tpu.memory_space<vmem>>, vector<1x8x8x4xbf16>
    %58 = vector.shape_cast %57 : vector<1x8x8x4xbf16> to vector<8x8x4xbf16>
    %59 = vector.shape_cast %58 : vector<8x8x4xbf16> to vector<64x4xbf16>
    %c8 = arith.constant 8 : index
    %c0_60 = arith.constant 0 : index
    %c0_61 = arith.constant 0 : index
    %60 = vector.load %arg3[%c8, %c0_60, %c0_61] : memref<9x4x128xbf16, #tpu.memory_space<vmem>>, vector<1x4x128xbf16>
    %61 = vector.shape_cast %60 : vector<1x4x128xbf16> to vector<4x128xbf16>
    %cst_62 = arith.constant dense<0.000000e+00> : vector<64x128xf32>
    %62 = tpu.matmul %59, %61, %cst_62 {dimension_numbers = #tpu.dot_dimension_numbers<[1], [0], [0], [1], [0, 0, 1, 1], [], []>} : vector<64x4xbf16>, vector<4x128xbf16>, vector<64x128xf32> -> vector<64x128xf32>
    %63 = arith.addf %56, %62 : vector<64x128xf32>
    %c0_63 = arith.constant 0 : index
    %c0_64 = arith.constant 0 : index
    %64 = vector.load %arg4[%c0_63, %c0_64] : memref<1x128xf32, #tpu.memory_space<vmem>>, vector<1x128xf32>
    %65 = vector.broadcast %64 : vector<1x128xf32> to vector<64x128xf32>
    %66 = arith.addf %63, %65 : vector<64x128xf32>
    %cst_65 = arith.constant 0.000000e+00 : f32
    %67 = vector.broadcast %cst_65 : f32 to vector<64x128xf32>
    %68 = arith.maximumf %66, %67 : vector<64x128xf32>
    %69 = arith.truncf %68 : vector<64x128xf32> to vector<64x128xbf16>
    %70 = vector.shape_cast %69 : vector<64x128xbf16> to vector<1x8x8x128xbf16>
    %c0_66 = arith.constant 0 : index
    %c0_67 = arith.constant 0 : index
    %c0_68 = arith.constant 0 : index
    %c0_69 = arith.constant 0 : index
    %71 = vector.load %arg5[%c0_66, %c0_67, %c0_68, %c0_69] : memref<1x8x8x128xbf16, #tpu.memory_space<vmem>>, vector<1x8x8x128xbf16>
    tpu.vector_store %arg5[%c0_66, %c0_67, %c0_68, %c0_69], %70 {strides = array<i32>} : memref<1x8x8x128xbf16, #tpu.memory_space<vmem>>, vector<1x8x8x128xbf16>,
    return
  }
  func.func @transform_0(%arg0: i32, %arg1: i32) -> (i32, i32, i32, i32) {
    %c0_i32 = arith.constant 0 : i32
    %c0_i32_0 = arith.constant 0 : i32
    %c0_i32_1 = arith.constant 0 : i32
    %c0_i32_2 = arith.constant 0 : i32
    return %arg0, %c0_i32, %c0_i32_0, %c0_i32_1 : i32, i32, i32, i32
  }
  func.func @transform_1(%arg0: i32, %arg1: i32) -> (i32, i32, i32) {
    %c0_i32 = arith.constant 0 : i32
    %c0_i32_0 = arith.constant 0 : i32
    %c0_i32_1 = arith.constant 0 : i32
    return %c0_i32, %c0_i32_0, %arg1 : i32, i32, i32
  }
  func.func @transform_2(%arg0: i32, %arg1: i32) -> (i32, i32) {
    %c0_i32 = arith.constant 0 : i32
    %c0_i32_0 = arith.constant 0 : i32
    return %c0_i32, %arg1 : i32, i32
  }
  func.func @transform_3(%arg0: i32, %arg1: i32) -> (i32, i32, i32, i32) {
    %c0_i32 = arith.constant 0 : i32
    %c0_i32_0 = arith.constant 0 : i32
    %c0_i32_1 = arith.constant 0 : i32
    return %arg0, %c0_i32, %c0_i32_0, %arg1 : i32, i32, i32, i32
  }
}

</mosaic_0001>

<bundles_post_ra>
// kernel: tpu_custom_call.1
= control target key start
LH: loop header
LB: loop body
LE: loop exit
PB: predicated region body
PF: predicated region fallthrough
CT: control target
= control target key end

     0   :  { %8 = vsyncpa [#allocation3], 0  ;;  %s2434_s0 = inlined_call_operand.vmem [shape: bf16[2,10,10,4], index: 0, kind: input, shape index: {}]   ;;  %s2435_s1 = inlined_call_operand.vmem [shape: bf16[9,4,128], index: 1, kind: input, shape index: {}]   ;;  %s2436_s2 = inlined_call_operand.vmem [shape: f32[1,128], index: 2, kind: input, shape index: {}]   ;;  %s2437_s3 = inlined_call_operand.hbm [shape: bf16[2,8,8,128], index: 3, kind: output, shape index: {}]  }
   0x1   :  { %10 = vsyncpa [#allocation3 + $0x1], 0  ;;  %s1940_s12 = smov 0   ;;  %s1942_s13 = smov 0  }
   0x2   :  { %s1944_s14 = smov 0   ;;  %s1946_s15 = smov 0  }
   0x3   :  { %s1948_s16 = smov 0   ;;  %s1950_s17 = smov 0  }
   0x4 LB: > { %s1546_s18 = sadd.s32 4294967295, %s1916_s17   ;;  %s1547_s19 = sadd.s32 4294967294, %s1916_s17   ;;  %s1916_s17 = sphi %s1950_s17, %s16_s17   ;;  %s1912_s16 = sphi %s1948_s16, %s2448_s16   ;;  %s1908_s15 = sphi %s1946_s15, %s2447_s15   ;;  %s1904_s14 = sphi %s1944_s14, %s2446_s14   ;;  %s1900_s13 = sphi %s1942_s13, %s2445_s13   ;;  %s1896_s12 = sphi %s1940_s12, %s2444_s12  }
   0x5   : > { %s28_s20 = sadd.s32 1, %s1912_s16  ;;  %s115_s21 = sadd.s32 1, %s1904_s14 }
   0x6   : > { %p30_p0 = scmp.ge.s32.totalorder %s28_s20, 2  ;;  %p125_p1 = scmp.ne.s32.totalorder %s1904_s14, %s1900_s13 }
   0x7   : > { %p126_p2 = scmp.eq.s32.totalorder %s1546_s18, 1  ;;  %p131_p3 = scmp.ne.s32.totalorder %s1900_s13, %s1896_s12 }
   0x8   : > { %s2450_s20 = smov (%p30_p0, %s28_s20), 0  ;;  %p132_p5 = scmp.eq.s32.totalorder %s1547_s19, 1 }
   0x9   : > { %p1980_p4 = por %p126_p2, %p125_p1  ;;  %s110_s23 = ssub.s32 %s1912_s16, %s2450_s20 }
   0xa   : > { %p1552_p6 = scmp.ge.s32.totalorder %s1916_s17, 1  ;;  %p113_p7 = scmp.eq.s32.totalorder %s110_s23, 0 }
   0xb   : > { %p1987_p8 = por %p132_p5, %p131_p3  ;;  %p171_p9 = scmp.lt.s32.totalorder %s1916_s17, 3 }
   0xc   : > { %s1993_s25 = scalar_select %p113_p7, %s1904_s14, %s115_s21  }
   0xd   : > { %p172_p10 = pnand %p1552_p6, %p171_p9 }
   0xe   : > { %p202_p11 = scmp.lt.s32.totalorder (!%p172_p10), %s1908_s15, 1  ;;  %s199_s7 = sand.u32 (!%p172_p10), 1, %s1900_s13  }
   0xf   : > { %175 = sbr.rel (%p172_p10) target bundleno = 332 (0x14c), region = 32  ;;  %s1553_s8 = sshll.u32 (!%p172_p10), %s199_s7, 5 }
  0x10   : > { %s2371_s9 = scalar_lea.vmem (!%p172_p10), [#allocation2], %s1553_s8  ;;  %s1752_s10 = sshll.u32 (!%p172_p10), %s1908_s15, 5 }
  0x11   : > { %s1444_s21 = sshll.u32 (!%p172_p10), %s2371_s9, 4  ;;  %s1445_s21 = int_to_ptr.vmem [resolvable:$true] %s1444_s21 }
  0x14   : > { %v1555_v0 = vld [vmem:[%s2435_s1 + $0x2] sm:$0x3]  ;;  %vm374_vm0 = vcmask 1041408   ;;  %v1588_v2 = vld [vmem:[%s2435_s1 + $0x4] sm:$0x3]  ;;  %s203_s30 = scalar_select %p202_p11, %s1908_s15, 1 }
  0x15   : > { %v376_v1 = vsel %vm374_vm0, %v1555_v0, 0  ;;  %v557_v3 = vsel %vm374_vm0, %v1588_v2, 0  ;;  %v1601_v4 = vld [vmem:[%s2435_s1 + $0x6] sm:$0x3]  ;;  %v223_v5 = vld [vmem:[%s2435_s1] sm:$0x3] }
  0x16   : > { %1776 = vmatpush.bf16.msra.mxu1 %v376_v1  ;;  %1777 = vmatpush.bf16.msra.mxu2 %v376_v1  ;;  %s1779_s4 = smul.u32 80, %s203_s30  ;;  %v640_v6 = vsel %vm374_vm0, %v1601_v4, 0  ;;  %v440_v7 = vsel %vm374_vm0, %v223_v5, 0  ;;  %v1638_v8 = vld [vmem:[%s2435_s1 + $0x8] sm:$0x3]  ;;  %vm361_vm3 = vcmask 31744  }
  0x17   : > { %1778 = vmatpush.bf16.msra.mxu3 %v376_v1  ;;  %385 = vmatpush.bf16.msra.mxu0 %v376_v1  ;;  %vm232_vm1 = vsmask.f32 3328  ;;  %vm233_vm2 = vsmask.f32 7440  ;;  %v834_v9 = vsel %vm374_vm0, %v1638_v8, 0  ;;  %vm495_vm5 = vcmask 1042432  }
  0x18   : > { %s2019_s19 = scalar_lea.vmem %s2434_s0, %s1779_s4  ;;  %vm2044_vm4 = vmor %vm232_vm1, %vm233_vm2  ;;  %vm496_vm6 = vcmask 1046532   ;;  %s1431_s15 = scalar_lea.sflag [#allocation3], %s199_s7 }
  0x19   : > { %v217_v10 = vld [vmem:[%s2019_s19 + $0x10] sm:$0xf]  ;;  %v218_v11 = vld [vmem:[%s2019_s19 + $0x18] sm:$0xf]  ;;  %v2025_v12 = vld [vmem:[%s2019_s19 + $0x14] sm:$0x1] }
  0x1a   : > { %566 = vmatpush.bf16.msrb.mxu2 %v557_v3  ;;  %449 = vmatpush.bf16.msrb.mxu1 %v440_v7  ;;  %v2028_v13 = vld [vmem:[%s2019_s19 + $0x1c] sm:$0x1]  ;;  %v264_v14 = vshrl.u32 %v217_v10, 16  ;;  %v267_v15 = vshll.u32 %v217_v10, 16  ;;  %v273_v16 = vshll.u32 %v2025_v12, 16  ;;  %v278_v17 = vshrl.u32 %v218_v11, 16  ;;  %vm2078_vm7 = vmor %vm495_vm5, %vm496_vm6 }
  0x1b   : > { %649 = vmatpush.bf16.msrb.mxu3 %v640_v6  ;;  %843 = vmatpush.bf16.msrb.mxu0 %v834_v9  ;;  %v281_v18 = vshll.u32 %v218_v11, 16  ;;  %v287_v19 = vshll.u32 %v2028_v13, 16  ;;  %v219_v20 = vld [vmem:[%s2019_s19 + $0x20] sm:$0xf]  ;;  %v220_v21 = vld [vmem:[%s2019_s19 + $0x28] sm:$0xf] }
  0x1c   : > { %v266_v22 = vrot.slane %v264_v14, 4  ;;  %v269_v23 = vrot.slane %v267_v15, 5  ;;  %v275_v24 = vrot.slane %v273_v16, 5  ;;  %v280_v25 = vrot.slane %v278_v17, 4  ;;  %v2035_v26 = vld [vmem:[%s2019_s19 + $0x24] sm:$0x1] }
  0x1d   : > { %v283_v27 = vrot.slane %v281_v18, 5  ;;  %v289_v28 = vrot.slane %v287_v19, 5  ;;  %v2038_v29 = vld [vmem:[%s2019_s19 + $0x2c] sm:$0x1]  ;;  %v292_v30 = vshrl.u32 %v219_v20, 16  ;;  %v295_v31 = vshll.u32 %v219_v20, 16 }
  0x1e   : > { %v270_v32 = vor.u32 %v269_v23, %v266_v22  ;;  %v301_v33 = vshll.u32 %v2035_v26, 16  ;;  %v306_v34 = vshrl.u32 %v220_v21, 16  ;;  %v309_v35 = vshll.u32 %v220_v21, 16  ;;  %v221_v36 = vld [vmem:[%s2019_s19 + $0x30] sm:$0xf]  ;;  %s1858_s30 = scalar_lea.hbm %s2437_s3, 64 }
  0x1f   : > { %v284_v38 = vor.u32 %v283_v27, %v280_v25  ;;  %v294_v39 = vrot.slane %v292_v30, 4  ;;  %v297_v40 = vrot.slane %v295_v31, 5  ;;  %v315_v41 = vshll.u32 %v2038_v29, 16  ;;  %v2050_v46 = vld [vmem:[%s2019_s19 + $0x34] sm:$0x1] }
  0x20   : > { %v271_v42 = vrot.slane %v270_v32, 4  ;;  %v303_v43 = vrot.slane %v301_v33, 5  ;;  %v308_v44 = vrot.slane %v306_v34, 4  ;;  %v311_v45 = vrot.slane %v309_v35, 5  ;;  %v222_v53 = vld [vmem:[%s2019_s19 + $0x38] sm:$0xf] }
  0x21   : > { %v285_v47 = vrot.slane %v284_v38, 4  ;;  %v298_v48 = vor.u32 %v297_v40, %v294_v39  ;;  %v317_v49 = vrot.slane %v315_v41, 5  ;;  %v320_v50 = vshrl.u32 %v221_v36, 16  ;;  %v2056_v54 = vld [vmem:[%s2019_s19 + $0x3c] sm:$0x1] }
  0x22   : > { %v276_v51 = vsel %vm2044_vm4, %v271_v42, %v275_v24  ;;  %v312_v52 = vor.u32 %v311_v45, %v308_v44  ;;  %v323_v55 = vshll.u32 %v221_v36, 16  ;;  %v329_v56 = vshll.u32 %v2050_v46, 16  ;;  %v215_v1 = vld [vmem:[%s2019_s19] sm:$0xf]  ;;  %v224_v6 = vld [vmem:[%s2019_s19 + $0x4] sm:$0x1] }
  0x23   : > { %v290_v57 = vsel %vm2044_vm4, %v285_v47, %v289_v28  ;;  %v351_v58 = vunpack.c.l.b16 %v276_v51  ;;  %v299_v59 = vrot.slane %v298_v48, 4  ;;  %v322_v60 = vrot.slane %v320_v50, 4  ;;  %v216_v11 = vld [vmem:[%s2019_s19 + $0x8] sm:$0xf]  ;;  %v225_v24 = vld [vmem:[%s2019_s19 + $0xc] sm:$0x1] }
  0x24   : > { %v352_v61 = vunpack.c.l.b16 %v290_v57  ;;  %v313_v62 = vrot.slane %v312_v52, 4  ;;  %v325_v63 = vrot.slane %v323_v55, 5  ;;  %v331_v0 = vrot.slane %v329_v56, 5  ;;  %v471_v33 = vld [vmem:[%s2019_s19] sm:$0xe] }
  0x25   : > { %v304_v2 = vsel %vm2044_vm4, %v299_v59, %v303_v43  ;;  %v334_v3 = vshrl.u32 %v222_v53, 16  ;;  %v337_v4 = vshll.u32 %v222_v53, 16  ;;  %v343_v5 = vshll.u32 %v2056_v54, 16  ;;  %v472_v39 = vld [vmem:[%s2019_s19 + $0x8] sm:$0xe] }
  0x26   : > { %v358_v7 = vpack.c.b16 %v352_v61, %v351_v58  ;;  %v318_v8 = vsel %vm2044_vm4, %v313_v62, %v317_v49  ;;  %v353_v9 = vunpack.c.l.b16 %v304_v2  ;;  %v326_v10 = vor.u32 %v325_v63, %v322_v60  ;;  %v1672_v45 = vld [vmem:[%s2435_s1 + $0xc] sm:$0x3]  ;;  %v1622_v55 = vld [vmem:[%s2019_s19 + $0x8] sm:$0xf]  ;;  %v1624_v59 = vld [vmem:[%s2019_s19 + $0x10] sm:$0xf] }
  0x27   : > { %v354_v14 = vunpack.c.l.b16 %v318_v8  ;;  %v336_v15 = vrot.slane %v334_v3, 4  ;;  %v339_v16 = vrot.slane %v337_v4, 5  ;;  %v345_v17 = vrot.slane %v343_v5, 5  ;;  %v2097_v63 = vld [vmem:[%s2019_s19 + $0xc] sm:$0x1] }
  0x28   : > { %1557 = vmatmul.msk.bf16.vlgmr.msra.gmra.mxu1 %vm361_vm3, %v358_v7  ;;  %v327_v18 = vrot.slane %v326_v10, 4  ;;  %v236_v19 = vshrl.u32 %v215_v1, 16  ;;  %v239_v20 = vshll.u32 %v215_v1, 16  ;;  %v245_v21 = vshll.u32 %v224_v6, 16  ;;  %v1562_v3 = vld [vmem:[%s2019_s19] sm:$0xf] }
  0x29   : > { %v359_v22 = vpack.c.b16 %v354_v14, %v353_v9  ;;  %v340_v23 = vor.u32 %v339_v16, %v336_v15  ;;  %v250_v25 = vshrl.u32 %v216_v11, 16  ;;  %v253_v27 = vshll.u32 %v216_v11, 16  ;;  %v1740_v4 = vld [vmem:[%s2019_s19 + $0x4] sm:$0xf0]  ;;  %v1709_v11 = vld [vmem:[%s2435_s1 + $0xe] sm:$0x3] }
  0x2a   : > { %v332_v28 = vsel %vm2044_vm4, %v327_v18, %v331_v0  ;;  %v238_v30 = vrot.slane %v236_v19, 4  ;;  %v241_v31 = vrot.slane %v239_v20, 5  ;;  %v247_v32 = vrot.slane %v245_v21, 5  ;;  %v2100_v0 = vld [vmem:[%s2019_s19 + $0x14] sm:$0x1] }
  0x2b   : > { %1558 = vmatmul.msk.bf16.vlgmr.msra.gmra.mxu2 %vm361_vm3, %v359_v22  ;;  %v341_v34 = vrot.slane %v340_v23, 4  ;;  %v355_v35 = vunpack.c.l.b16 %v332_v28  ;;  %v252_v36 = vrot.slane %v250_v25, 4  ;;  %v255_v38 = vrot.slane %v253_v27, 5  ;;  %v1659_v14 = vld [vmem:[%s2435_s1 + $0xa] sm:$0x3] }
  0x2c   : > { %v242_v40 = vor.u32 %v241_v31, %v238_v30  ;;  %v259_v41 = vshll.u32 %v225_v24, 16  ;;  %v500_v42 = vrot.slane %v224_v6, 5  ;;  %v504_v43 = vrot.slane %v225_v24, 5  ;;  %v1730_v19 = vld [vmem:[%s2435_s1 + $0x10] sm:$0x3] }
  0x2d   : > { %v346_v47 = vsel %vm2044_vm4, %v341_v34, %v345_v17  ;;  %v256_v48 = vor.u32 %v255_v38, %v252_v36  ;;  %v1580_v49 = vrot.slane %v471_v33, 9  ;;  %v1581_v53 = vrot.slane %v472_v39, 9  ;;  %v1626_v38 = vld [vmem:[%s2019_s19 + $0x18] sm:$0xf] }
  0x2e   : > { %v356_v50 = vunpack.c.l.b16 %v346_v47  ;;  %v243_v51 = vrot.slane %v242_v40, 4  ;;  %v261_v52 = vrot.slane %v259_v41, 5  ;;  %v1039_v58 = vsel %vm374_vm0, %v1672_v45, 0  ;;  %v474_v40 = vld [vmem:[%s2019_s19 + $0x18] sm:$0xe] }
  0x2f   : > { %v257_v56 = vrot.slane %v256_v48, 4  ;;  %v501_v57 = vsel %vm2078_vm7, %v1580_v49, %v500_v42  ;;  %v505_v62 = vsel %vm2078_vm7, %v1581_v53, %v504_v43  ;;  %1048 = vmatpush.bf16.msra.mxu2 %v1039_v58  ;;  %v696_v6 = vshrl.u32 %v1622_v55, 16  ;;  %v1628_v41 = vld [vmem:[%s2019_s19 + $0x20] sm:$0xf]  ;;  %v1604_v45 = vld [vmem:[%s2019_s19 + $0x8] sm:$0xf] }
  0x30   : > { %v360_v60 = vpack.c.b16 %v356_v50, %v355_v35  ;;  %v248_v61 = vsel %vm2044_vm4, %v243_v51, %v247_v32  ;;  %v532_v5 = vunpack.c.l.b16 %v501_v57  ;;  %v533_v8 = vunpack.c.l.b16 %v505_v62  ;;  %v473_v35 = vld [vmem:[%s2019_s19 + $0x10] sm:$0xe] }
  0x31   : > { %v262_v1 = vsel %vm2044_vm4, %v257_v56, %v261_v52  ;;  %v349_v2 = vunpack.c.l.b16 %v248_v61  ;;  %v699_v9 = vshll.u32 %v1622_v55, 16  ;;  %v710_v10 = vshrl.u32 %v1624_v59, 16  ;;  %v1744_v47 = vld [vmem:[%s2019_s19 + $0xc] sm:$0xf0] }
  0x32   : > { %1559 = vmatmul.msk.bf16.vlgmr.msra.gmra.mxu3 %vm361_vm3, %v360_v60  ;;  %v350_v7 = vunpack.c.l.b16 %v262_v1  ;;  %v698_v15 = vrot.slane %v696_v6, 4  ;;  %v705_v16 = vshll.u32 %v2097_v63, 16  ;;  %v713_v17 = vshll.u32 %v1624_v59, 16  ;;  %v2139_v60 = vld [vmem:[%s2019_s19 + $0x1c] sm:$0x1] }
  0x33   : > { %v719_v18 = vshll.u32 %v2100_v0, 16  ;;  %v1563_v21 = vor.u32 %v1740_v4, %v1562_v3  ;;  %v701_v22 = vrot.slane %v699_v9, 5  ;;  %v712_v23 = vrot.slane %v710_v10, 4  ;;  %v2144_v4 = vld [vmem:[%s2019_s19 + $0x24] sm:$0x1] }
  0x34   : > { %v357_v20 = vpack.c.b16 %v350_v7, %v349_v2  ;;  %v715_v24 = vrot.slane %v713_v17, 5  ;;  %v1233_v27 = vsel %vm374_vm0, %v1709_v11, 0  ;;  %v956_v28 = vsel %vm374_vm0, %v1659_v14, 0  ;;  %v1630_v17 = vld [vmem:[%s2019_s19 + $0x28] sm:$0xf] }
  0x35   : > { %v702_v25 = vor.u32 %v701_v22, %v698_v15  ;;  %v1355_v30 = vsel %vm374_vm0, %v1730_v19, 0  ;;  %v540_v31 = vpack.c.b16 %v533_v8, %v532_v5  ;;  %v707_v32 = vrot.slane %v705_v16, 5  ;;  %1242 = vmatpush.bf16.msra.mxu3 %v1233_v27  ;;  %965 = vmatpush.bf16.msra.mxu1 %v956_v28  ;;  %v1741_v5 = vld [vmem:[%s2019_s19 + $0x14] sm:$0xf0]  ;;  %v1632_v22 = vld [vmem:[%s2019_s19 + $0x30] sm:$0xf] }
  0x36   : > { %1556 = vmatmul.msk.bf16.vlgmr.msra.gmra.mxu0 %vm361_vm3, %v357_v20  ;;  %v716_v33 = vor.u32 %v715_v24, %v712_v23  ;;  %v721_v34 = vrot.slane %v719_v18, 5  ;;  %v1582_v42 = vrot.slane %v473_v35, 9  ;;  %v508_v43 = vrot.slane %v2025_v12, 5  ;;  %v475_v23 = vld [vmem:[%s2019_s19 + $0x20] sm:$0xe] }
  0x37   : > { %v703_v36 = vrot.slane %v702_v25, 4  ;;  %1364 = vmatpush.bf16.msra.mxu0 %v1355_v30  ;;  %v724_v50 = vshrl.u32 %v1626_v38, 16  ;;  %v727_v51 = vshll.u32 %v1626_v38, 16  ;;  %v1583_v52 = vrot.slane %v474_v40, 9  ;;  %v476_v24 = vld [vmem:[%s2019_s19 + $0x28] sm:$0xe] }
  0x38   : > { %1576 = vmatmul.msk.bf16.vlgmr.msrb.gmra.mxu1 %vm361_vm3, %v1563_v21  ;;  %v717_v39 = vrot.slane %v716_v33, 4  ;;  %v512_v53 = vrot.slane %v2028_v13, 5  ;;  %v738_v12 = vshrl.u32 %v1628_v41, 16  ;;  %v741_v55 = vshll.u32 %v1628_v41, 16  ;;  %v1566_v13 = vld [vmem:[%s2019_s19 + $0x10] sm:$0xf] }
  0x39   : > { %v708_v48 = vsel %vm2044_vm4, %v703_v36, %v707_v32  ;;  %v1605_v56 = vor.u32 %v1744_v47, %v1604_v45  ;;  %v509_v59 = vsel %vm2078_vm7, %v1582_v42, %v508_v43  ;;  %v726_v61 = vrot.slane %v724_v50, 4  ;;  %v1608_v28 = vld [vmem:[%s2019_s19 + $0x18] sm:$0xf]  ;;  %v1745_v30 = vld [vmem:[%s2019_s19 + $0x1c] sm:$0xf0] }
  0x3a   : > { %v722_v49 = vsel %vm2044_vm4, %v717_v39, %v721_v34  ;;  %v809_v57 = vunpack.c.l.b16 %v708_v48  ;;  %v729_v62 = vrot.slane %v727_v51, 5  ;;  %v740_v1 = vrot.slane %v738_v12, 4  ;;  %v2167_v47 = vld [vmem:[%s2019_s19 + $0x2c] sm:$0x1] }
  0x3b   : > { %1589 = vmatmul.msk.bf16.vlgmr.msrb.gmra.mxu2 %vm361_vm3, %v540_v31  ;;  %v810_v58 = vunpack.c.l.b16 %v722_v49  ;;  %v743_v2 = vrot.slane %v741_v55, 5  ;;  %v513_v3 = vsel %vm2078_vm7, %v1583_v52, %v512_v53  ;;  %v534_v7 = vunpack.c.l.b16 %v509_v59  ;;  %v1570_v52 = vld [vmem:[%s2019_s19 + $0x20] sm:$0xf] }
  0x3c   : > { %v733_v8 = vshll.u32 %v2139_v60, 16  ;;  %v535_v9 = vunpack.c.l.b16 %v513_v3  ;;  %v730_v10 = vor.u32 %v729_v62, %v726_v61  ;;  %v747_v14 = vshll.u32 %v2144_v4, 16 }
  0x3d   : > { %v817_v6 = vpack.c.b16 %v810_v58, %v809_v57  ;;  %v744_v11 = vor.u32 %v743_v2, %v740_v1  ;;  %v1567_v15 = vor.u32 %v1741_v5, %v1566_v13  ;;  %v752_v25 = vshrl.u32 %v1630_v17, 16  ;;  %v477_v2 = vld [vmem:[%s2019_s19 + $0x30] sm:$0xe] }
  0x3e   : > { %v735_v16 = vrot.slane %v733_v8, 5  ;;  %v541_v18 = vpack.c.b16 %v535_v9, %v534_v7  ;;  %v731_v19 = vrot.slane %v730_v10, 4  ;;  %v749_v21 = vrot.slane %v747_v14, 5  ;;  %v1634_v7 = vld [vmem:[%s2019_s19 + $0x38] sm:$0xf] }
  0x3f   : > { %v745_v20 = vrot.slane %v744_v11, 4  ;;  %v755_v27 = vshll.u32 %v1630_v17, 16  ;;  %v766_v33 = vshrl.u32 %v1632_v22, 16  ;;  %v769_v34 = vshll.u32 %v1632_v22, 16  ;;  %v1636_v8 = vld [vmem:[%s2019_s19 + $0x40] sm:$0xf] }
  0x40   : > { %v736_v31 = vsel %vm2044_vm4, %v731_v19, %v735_v16  ;;  %v1584_v35 = vrot.slane %v475_v23, 9  ;;  %v516_v36 = vrot.slane %v2035_v26, 5  ;;  %v1585_v38 = vrot.slane %v476_v24, 9  ;;  %v2174_v26 = vld [vmem:[%s2019_s19 + $0x34] sm:$0x1] }
  0x41   : > { %v750_v32 = vsel %vm2044_vm4, %v745_v20, %v749_v21  ;;  %v520_v39 = vrot.slane %v2038_v29, 5  ;;  %v754_v40 = vrot.slane %v752_v25, 4  ;;  %v757_v41 = vrot.slane %v755_v27, 5  ;;  %v1742_v29 = vld [vmem:[%s2019_s19 + $0x24] sm:$0xf0] }
  0x42   : > { %1618 = vmatmul.msk.bf16.vlgmr.msrb.gmra.mxu3 %vm361_vm3, %v1605_v56  ;;  %v1609_v42 = vor.u32 %v1745_v30, %v1608_v28  ;;  %v811_v43 = vunpack.c.l.b16 %v736_v31  ;;  %v812_v45 = vunpack.c.l.b16 %v750_v32  ;;  %v768_v48 = vrot.slane %v766_v33, 4  ;;  %v1612_v9 = vld [vmem:[%s2019_s19 + $0x28] sm:$0xf]  ;;  %v1746_v14 = vld [vmem:[%s2019_s19 + $0x2c] sm:$0xf0] }
  0x43   : > { %v771_v49 = vrot.slane %v769_v34, 5  ;;  %v517_v50 = vsel %vm2078_vm7, %v1584_v35, %v516_v36  ;;  %v521_v51 = vsel %vm2078_vm7, %v1585_v38, %v520_v39  ;;  %v758_v53 = vor.u32 %v757_v41, %v754_v40  ;;  %v2201_v27 = vld [vmem:[%s2019_s19 + $0x3c] sm:$0x1]  ;;  %v2204_v28 = vld [vmem:[%s2019_s19 + $0x44] sm:$0x1] }
  0x44   : > { %v761_v12 = vshll.u32 %v2167_v47, 16  ;;  %v818_v55 = vpack.c.b16 %v812_v45, %v811_v43  ;;  %v536_v56 = vunpack.c.l.b16 %v517_v50  ;;  %v537_v57 = vunpack.c.l.b16 %v521_v51  ;;  %v1574_v34 = vld [vmem:[%s2019_s19 + $0x30] sm:$0xf]  ;;  %v1743_v35 = vld [vmem:[%s2019_s19 + $0x34] sm:$0xf0] }
  0x45   : > { %v772_v58 = vor.u32 %v771_v49, %v768_v48  ;;  %v775_v59 = vshll.u32 %v2174_v26, 16  ;;  %v1571_v61 = vor.u32 %v1742_v29, %v1570_v52  ;;  %v759_v62 = vrot.slane %v758_v53, 4  ;;  %v1695_v49 = vld [vmem:[%s2019_s19 + $0x18] sm:$0xf] }
  0x46   : > { %1639 = vmatmul.msk.bf16.vlgmr.msrb.gmra.mxu0 %vm361_vm3, %v817_v6  ;;  %v763_v1 = vrot.slane %v761_v12, 5  ;;  %v542_v3 = vpack.c.b16 %v537_v57, %v536_v56  ;;  %v478_v6 = vld [vmem:[%s2019_s19 + $0x38] sm:$0xe]  ;;  %v524_v11 = vrot.slane %v2050_v46, 5  ;;  %v528_v17 = vrot.slane %v2056_v54, 5 }
  0x47   : > { %v773_v13 = vrot.slane %v772_v58, 4  ;;  %v777_v5 = vrot.slane %v775_v59, 5  ;;  %v1587_v16 = vrot.slane %v478_v6, 9  ;;  %v783_v20 = vshll.u32 %v1634_v7, 16  ;;  %v1643_v12 = vld [vmem:[%s2019_s19 + $0x8] sm:$0xe] }
  0x48   : > { %1577 = vmatmul.msk.bf16.gmra.mxu1 %vm361_vm3, %v1567_v15  ;;  %v764_v10 = vsel %vm2044_vm4, %v759_v62, %v763_v1  ;;  %v1586_v15 = vrot.slane %v477_v2, 9  ;;  %v794_v21 = vshrl.u32 %v1636_v8, 16  ;;  %v797_v22 = vshll.u32 %v1636_v8, 16  ;;  %v1616_v6 = vld [vmem:[%s2019_s19 + $0x38] sm:$0xf] }
  0x49   : > { %v778_v19 = vsel %vm2044_vm4, %v773_v13, %v777_v5  ;;  %v1613_v23 = vor.u32 %v1746_v14, %v1612_v9  ;;  %v813_v46 = vunpack.c.l.b16 %v764_v10  ;;  %v529_v54 = vsel %vm2078_vm7, %v1587_v16, %v528_v17  ;;  %v1694_v5 = vld [vmem:[%s2019_s19 + $0x14] sm:$0x1] }
  0x4a   : > { %v814_v24 = vunpack.c.l.b16 %v778_v19  ;;  %v525_v25 = vsel %vm2078_vm7, %v1586_v15, %v524_v11  ;;  %v785_v31 = vrot.slane %v783_v20, 5  ;;  %v796_v32 = vrot.slane %v794_v21, 4 }
  0x4b   : > { %1590 = vmatmul.msk.bf16.gmra.mxu2 %vm361_vm3, %v541_v18  ;;  %v780_v18 = vshrl.u32 %v1634_v7, 16  ;;  %v799_v33 = vrot.slane %v797_v22, 5  ;;  %v538_v36 = vunpack.c.l.b16 %v525_v25  ;;  %v539_v39 = vunpack.c.l.b16 %v529_v54  ;;  %v1747_v7 = vld [vmem:[%s2019_s19 + $0x3c] sm:$0xf0]  ;;  %v1675_v54 = vld [vmem:[%s2019_s19 + $0x10] sm:$0xf] }
  0x4c   : > { %v819_v38 = vpack.c.b16 %v814_v24, %v813_v46  ;;  %v789_v40 = vshll.u32 %v2201_v27, 16  ;;  %v803_v41 = vshll.u32 %v2204_v28, 16  ;;  %v1575_v48 = vor.u32 %v1743_v35, %v1574_v34  ;;  %v1697_v35 = vld [vmem:[%s2019_s19 + $0x20] sm:$0xf] }
  0x4d   : > { %v782_v30 = vrot.slane %v780_v18, 4  ;;  %v800_v45 = vor.u32 %v799_v33, %v796_v32  ;;  %v543_v52 = vpack.c.b16 %v539_v39, %v538_v36  ;;  %v1109_v58 = vshrl.u32 %v1695_v49, 16  ;;  %v1748_v32 = vld [vmem:[%s2019_s19 + $0x14] sm:$0xf0] }
  0x4e   : > { %v791_v29 = vrot.slane %v789_v40, 5  ;;  %v805_v53 = vrot.slane %v803_v41, 5  ;;  %v1112_v59 = vshll.u32 %v1695_v49, 16  ;;  %v903_v62 = vrot.slane %v2100_v0, 5  ;;  %v1696_v0 = vld [vmem:[%s2019_s19 + $0x1c] sm:$0x1] }
  0x4f   : > { %v786_v43 = vor.u32 %v785_v31, %v782_v30  ;;  %v801_v57 = vrot.slane %v800_v45, 4  ;;  %v1651_v1 = vrot.slane %v1643_v12, 9  ;;  %v1104_v16 = vshll.u32 %v1694_v5, 16  ;;  %v1714_v30 = vld [vmem:[%s2019_s19 + $0x10] sm:$0xe] }
  0x50   : > { %v1114_v10 = vrot.slane %v1112_v59, 5  ;;  %v1617_v17 = vor.u32 %v1747_v7, %v1616_v6  ;;  %v1118_v21 = vshll.u32 %v1696_v0, 16  ;;  %v1715_v31 = vld [vmem:[%s2019_s19 + $0x18] sm:$0xe]  ;;  %v1722_v40 = vrot.slane %v1714_v30, 9 }
  0x51   : > { %v787_v56 = vrot.slane %v786_v43, 4  ;;  %v806_v9 = vsel %vm2044_vm4, %v801_v57, %v805_v53  ;;  %v1106_v24 = vrot.slane %v1104_v16, 5  ;;  %v1298_v41 = vrot.slane %v1694_v5, 5  ;;  %v1645_v45 = vld [vmem:[%s2019_s19 + $0x18] sm:$0xe] }
  0x52   : > { %1619 = vmatmul.msk.bf16.gmra.mxu3 %vm361_vm3, %v1609_v42  ;;  %v1693_v42 = vld [vmem:[%s2019_s19 + $0x10] sm:$0xf]  ;;  %v816_v19 = vunpack.c.l.b16 %v806_v9  ;;  %v1120_v34 = vrot.slane %v1118_v21, 5  ;;  %v1676_v43 = vor.u32 %v1748_v32, %v1675_v54  ;;  %v1123_v49 = vshrl.u32 %v1697_v35, 16  ;;  %v1700_v6 = vld [vmem:[%s2019_s19 + $0x2c] sm:$0x1] }
  0x53   : > { %v1095_v50 = vshrl.u32 %v1693_v42, 16  ;;  %v1098_v51 = vshll.u32 %v1693_v42, 16  ;;  %v792_v8 = vsel %vm2044_vm4, %v787_v56, %v791_v29  ;;  %v1723_v42 = vrot.slane %v1715_v31, 9  ;;  %v1679_v16 = vld [vmem:[%s2019_s19 + $0x20] sm:$0xf] }
  0x54   : > { %v815_v18 = vunpack.c.l.b16 %v792_v8  ;;  %v907_v56 = vrot.slane %v2139_v60, 5  ;;  %v1701_v21 = vld [vmem:[%s2019_s19 + $0x30] sm:$0xf]  ;;  %v1703_v54 = vld [vmem:[%s2019_s19 + $0x38] sm:$0xf] }
  0x55   : > { %v1100_v13 = vrot.slane %v1098_v51, 5  ;;  %v1151_v31 = vshrl.u32 %v1701_v21, 16  ;;  %v1154_v32 = vshll.u32 %v1701_v21, 16 }
  0x56   : > { %1640 = vmatmul.msk.bf16.gmra.mxu0 %vm361_vm3, %v818_v55  ;;  %v1644_v55 = vld [vmem:[%s2019_s19 + $0x10] sm:$0xe]  ;;  %v820_v25 = vpack.c.b16 %v816_v19, %v815_v18 }
  0x57   : > { %v1652_v2 = vrot.slane %v1644_v55, 9  ;;  %v1653_v55 = vrot.slane %v1645_v45, 9  ;;  %v915_v45 = vrot.slane %v2167_v47, 5  ;;  %v1704_v47 = vld [vmem:[%s2019_s19 + $0x3c] sm:$0x1] }
  0x58   : > { %1578 = vmatmul.msk.bf16.gmra.mxu1 %vm361_vm3, %v1571_v61  ;;  %v899_v61 = vrot.slane %v2097_v63, 5  ;;  %v1111_v63 = vrot.slane %v1109_v58, 4  ;;  %v911_v58 = vrot.slane %v2144_v4, 5 }
  0x59   : > { %v904_v14 = vsel %vm2078_vm7, %v1652_v2, %v903_v62  ;;  %v1125_v62 = vrot.slane %v1123_v49, 4  ;;  %v908_v4 = vsel %vm2078_vm7, %v1653_v55, %v907_v56 }
  0x5a   : > { %v900_v11 = vsel %vm2078_vm7, %v1651_v1, %v899_v61  ;;  %v1115_v20 = vor.u32 %v1114_v10, %v1111_v63  ;;  %v1299_v61 = vsel %vm2078_vm7, %v1722_v40, %v1298_v41  ;;  %v1310_v41 = vrot.slane %v1700_v6, 5 }
  0x5b   : > { %1591 = vmatmul.msk.bf16.gmra.mxu2 %vm361_vm3, %v542_v3  ;;  %v1097_v3 = vrot.slane %v1095_v50, 4  ;;  %v931_v22 = vunpack.c.l.b16 %v900_v11  ;;  %v1126_v50 = vshll.u32 %v1697_v35, 16  ;;  %v1330_v60 = vunpack.c.l.b16 %v1299_v61 }
  0x5c   : > { %v1116_v33 = vrot.slane %v1115_v20, 4  ;;  %v1146_v11 = vshll.u32 %v1700_v6, 16  ;;  %v1716_v20 = vld [vmem:[%s2019_s19 + $0x20] sm:$0xe] }
  0x5d   : > { %v1101_v15 = vor.u32 %v1100_v13, %v1097_v3  ;;  %v1128_v1 = vrot.slane %v1126_v50, 5  ;;  %v1698_v3 = vld [vmem:[%s2019_s19 + $0x24] sm:$0x1]  ;;  %v1724_v30 = vrot.slane %v1716_v20, 9 }
  0x5e   : > { %v1121_v51 = vsel %vm2044_vm4, %v1116_v33, %v1120_v34  ;;  %v1132_v10 = vshll.u32 %v1698_v3, 16  ;;  %v1306_v35 = vrot.slane %v1698_v3, 5 }
  0x5f   : > { %v1102_v46 = vrot.slane %v1101_v15, 4  ;;  %v1209_v59 = vunpack.c.l.b16 %v1121_v51  ;;  %v1129_v63 = vor.u32 %v1128_v1, %v1125_v62  ;;  %v1153_v51 = vrot.slane %v1151_v31, 4 }
  0x60   : > { %v1134_v19 = vrot.slane %v1132_v10, 5  ;;  %v1307_v55 = vsel %vm2078_vm7, %v1724_v30, %v1306_v35  ;;  %v1719_v10 = vld [vmem:[%s2019_s19 + $0x38] sm:$0xe]  ;;  %v1318_v30 = vrot.slane %v1704_v47, 5  ;;  %v923_v35 = vrot.slane %v2201_v27, 5 }
  0x61   : > { %v1107_v39 = vsel %vm2044_vm4, %v1102_v46, %v1106_v24  ;;  %v1130_v18 = vrot.slane %v1129_v63, 4  ;;  %v1148_v46 = vrot.slane %v1146_v11, 5  ;;  %v1717_v24 = vld [vmem:[%s2019_s19 + $0x28] sm:$0xe]  ;;  %v1718_v63 = vld [vmem:[%s2019_s19 + $0x30] sm:$0xe] }
  0x62   : > { %1620 = vmatmul.msk.bf16.gmra.mxu3 %vm361_vm3, %v1613_v23  ;;  %v932_v23 = vunpack.c.l.b16 %v904_v14  ;;  %v1208_v12 = vunpack.c.l.b16 %v1107_v39  ;;  %v933_v14 = vunpack.c.l.b16 %v908_v4  ;;  %v1648_v39 = vld [vmem:[%s2019_s19 + $0x30] sm:$0xe]  ;;  %v1727_v21 = vrot.slane %v1719_v10, 9 }
  0x63   : > { %v1135_v34 = vsel %vm2044_vm4, %v1130_v18, %v1134_v19  ;;  %v1656_v50 = vrot.slane %v1648_v39, 9  ;;  %v1726_v19 = vrot.slane %v1718_v63, 9 }
  0x64   : > { %v939_v36 = vpack.c.b16 %v932_v23, %v931_v22  ;;  %v1216_v8 = vpack.c.b16 %v1209_v59, %v1208_v12  ;;  %v1749_v22 = vld [vmem:[%s2019_s19 + $0x24] sm:$0xf0]  ;;  %v1702_v12 = vld [vmem:[%s2019_s19 + $0x34] sm:$0x1] }
  0x65   : > { %v1680_v33 = vor.u32 %v1749_v22, %v1679_v16  ;;  %v1160_v62 = vshll.u32 %v1702_v12, 16  ;;  %v1314_v20 = vrot.slane %v1702_v12, 5 }
  0x66   : > { %1641 = vmatmul.msk.bf16.gmra.mxu0 %vm361_vm3, %v819_v38  ;;  %v1699_v38 = vld [vmem:[%s2019_s19 + $0x28] sm:$0xf] }
  0x67   : > { %v1137_v29 = vshrl.u32 %v1699_v38, 16  ;;  %v1140_v53 = vshll.u32 %v1699_v38, 16  ;;  %v1647_v38 = vld [vmem:[%s2019_s19 + $0x28] sm:$0xe] }
  0x68   : > { %1579 = vmatmul.msk.bf16.gmra.mxu1 %vm361_vm3, %v1575_v48  ;;  %v1646_v48 = vld [vmem:[%s2019_s19 + $0x20] sm:$0xe]  ;;  %v1655_v49 = vrot.slane %v1647_v38, 9  ;;  %v927_v38 = vrot.slane %v2204_v28, 5 }
  0x69   : > { %v1654_v57 = vrot.slane %v1646_v48, 9  ;;  %v1139_v13 = vrot.slane %v1137_v29, 4  ;;  %v1142_v5 = vrot.slane %v1140_v53, 5  ;;  %v919_v48 = vrot.slane %v2174_v26, 5 }
  0x6a   : > { %v1210_v29 = vunpack.c.l.b16 %v1135_v34  ;;  %v916_v26 = vsel %vm2078_vm7, %v1655_v49, %v915_v45  ;;  %v1706_v45 = vld [vmem:[%s2019_s19 + $0x44] sm:$0x1] }
  0x6b   : > { %1592 = vmatmul.msk.bf16.gmra.mxu2 %vm361_vm3, %v543_v52  ;;  %v1302_v52 = vrot.slane %v1696_v0, 5  ;;  %v912_v7 = vsel %vm2078_vm7, %v1654_v57, %v911_v58  ;;  %v1143_v0 = vor.u32 %v1142_v5, %v1139_v13  ;;  %v920_v59 = vsel %vm2078_vm7, %v1656_v50, %v919_v48  ;;  %v1708_v50 = vld [vmem:[%s2019_s19 + $0x4c] sm:$0x1] }
  0x6c   : > { %v934_v15 = vunpack.c.l.b16 %v912_v7  ;;  %v1174_v5 = vshll.u32 %v1704_v47, 16  ;;  %v935_v6 = vunpack.c.l.b16 %v916_v26  ;;  %v1162_v7 = vrot.slane %v1160_v62, 5 }
  0x6d   : > { %v1303_v2 = vsel %vm2078_vm7, %v1723_v42, %v1302_v52  ;;  %v1144_v23 = vrot.slane %v1143_v0, 4  ;;  %v1165_v42 = vshrl.u32 %v1703_v54, 16  ;;  %v1156_v52 = vrot.slane %v1154_v32, 5  ;;  %v1750_v0 = vld [vmem:[%s2019_s19 + $0x34] sm:$0xf0] }
  0x6e   : > { %v1331_v9 = vunpack.c.l.b16 %v1303_v2  ;;  %v1332_v2 = vunpack.c.l.b16 %v1307_v55  ;;  %v1188_v12 = vshll.u32 %v1706_v45, 16  ;;  %v1326_v10 = vrot.slane %v1708_v50, 5 }
  0x6f   : > { %v1149_v40 = vsel %vm2044_vm4, %v1144_v23, %v1148_v46  ;;  %v1167_v57 = vrot.slane %v1165_v42, 4  ;;  %v1157_v61 = vor.u32 %v1156_v52, %v1153_v51  ;;  %v1649_v23 = vld [vmem:[%s2019_s19 + $0x38] sm:$0xe]  ;;  %v1650_v46 = vld [vmem:[%s2019_s19 + $0x40] sm:$0xe] }
  0x70   : > { %v1211_v53 = vunpack.c.l.b16 %v1149_v40  ;;  %v1657_v34 = vrot.slane %v1649_v23, 9  ;;  %v1315_v40 = vsel %vm2078_vm7, %v1726_v19, %v1314_v20 }
  0x71   : > { %v1158_v4 = vrot.slane %v1157_v61, 4  ;;  %v1334_v51 = vunpack.c.l.b16 %v1315_v40 }
  0x72   : > { %1621 = vmatmul.msk.bf16.gmra.mxu3 %vm361_vm3, %v1617_v17  ;;  %v1338_v17 = vpack.c.b16 %v1331_v9, %v1330_v60  ;;  %v1217_v1 = vpack.c.b16 %v1211_v53, %v1210_v29  ;;  %v936_v60 = vunpack.c.l.b16 %v920_v59  ;;  %v1683_v9 = vld [vmem:[%s2019_s19 + $0x30] sm:$0xf]  ;;  %v924_v27 = vsel %vm2078_vm7, %v1657_v34, %v923_v35 }
  0x73   : > { %v1163_v18 = vsel %vm2044_vm4, %v1158_v4, %v1162_v7  ;;  %v1684_v22 = vor.u32 %v1750_v0, %v1683_v9  ;;  %v1190_v59 = vrot.slane %v1188_v12, 5  ;;  %v1322_v7 = vrot.slane %v1706_v45, 5 }
  0x74   : > { %v941_v16 = vpack.c.b16 %v936_v60, %v935_v6 }
  0x76   : > { %1642 = vmatmul.msk.bf16.gmra.mxu0 %vm361_vm3, %v820_v25  ;;  %v940_v25 = vpack.c.b16 %v934_v15, %v933_v14  ;;  %v1176_v14 = vrot.slane %v1174_v5, 5  ;;  %v1705_v15 = vld [vmem:[%s2019_s19 + $0x40] sm:$0xf]  ;;  %v1721_v5 = vld [vmem:[%s2019_s19 + $0x48] sm:$0xe] }
  0x77   : > { %v1729_v63 = vrot.slane %v1721_v5, 9 }
  0x78   : > { %1660 = vmatmul.msk.bf16.vlgmr.msra.gmra.mxu1 %vm361_vm3, %v939_v36  ;;  %v1725_v36 = vrot.slane %v1717_v24, 9  ;;  %v1179_v24 = vshrl.u32 %v1705_v15, 16 }
  0x7a   : > { %v1311_v56 = vsel %vm2078_vm7, %v1725_v36, %v1310_v41  ;;  %v1658_v36 = vrot.slane %v1650_v46, 9  ;;  %v1181_v41 = vrot.slane %v1179_v24, 4 }
  0x7b   : > { %1689 = vmatmul.msk.bf16.vlgmr.msra.gmra.mxu2 %vm361_vm3, %v1676_v43  ;;  %v1168_v43 = vshll.u32 %v1703_v54, 16  ;;  %v1333_v3 = vunpack.c.l.b16 %v1311_v56  ;;  %v1202_v56 = vshll.u32 %v1708_v50, 16 }
  0x7c   : > { %v928_v28 = vsel %vm2078_vm7, %v1658_v36, %v927_v38 }
  0x7d   : > { %v1170_v58 = vrot.slane %v1168_v43, 5  ;;  %v1319_v43 = vsel %vm2078_vm7, %v1727_v21, %v1318_v30  ;;  %v1204_v62 = vrot.slane %v1202_v56, 5 }
  0x7e   : > { %v1335_v29 = vunpack.c.l.b16 %v1319_v43 }
  0x7f   : > { %v1171_v13 = vor.u32 %v1170_v58, %v1167_v57  ;;  %v937_v57 = vunpack.c.l.b16 %v924_v27  ;;  %v938_v58 = vunpack.c.l.b16 %v928_v28 }
  0x80   : > { %v1340_v47 = vpack.c.b16 %v1335_v29, %v1334_v51 }
  0x81   : > { %v1172_v11 = vrot.slane %v1171_v13, 4  ;;  %v1751_v13 = vld [vmem:[%s2019_s19 + $0x44] sm:$0xf0] }
  0x82   : > { %1710 = vmatmul.msk.bf16.vlgmr.msra.gmra.mxu3 %vm361_vm3, %v1216_v8  ;;  %v1339_v8 = vpack.c.b16 %v1333_v3, %v1332_v2  ;;  %v942_v2 = vpack.c.b16 %v938_v58, %v937_v57  ;;  %v1687_v3 = vld [vmem:[%s2019_s19 + $0x40] sm:$0xf] }
  0x83   : > { %v1177_v54 = vsel %vm2044_vm4, %v1172_v11, %v1176_v14 }
  0x84   : > { %v1213_v39 = vunpack.c.l.b16 %v1177_v54 }
  0x86   : > { %1731 = vmatmul.msk.bf16.vlgmr.msra.gmra.mxu0 %vm361_vm3, %v1338_v17  ;;  %v1707_v17 = vld [vmem:[%s2019_s19 + $0x48] sm:$0xf] }
  0x87   : > { %v1193_v31 = vshrl.u32 %v1707_v17, 16  ;;  %v1196_v32 = vshll.u32 %v1707_v17, 16 }
  0x88   : > { %1661 = vmatmul.msk.bf16.gmra.mxu1 %vm361_vm3, %v940_v25  ;;  %v1182_v25 = vshll.u32 %v1705_v15, 16  ;;  %v1327_v15 = vsel %vm2078_vm7, %v1729_v63, %v1326_v10 }
  0x89   : > { %v1195_v48 = vrot.slane %v1193_v31, 4  ;;  %v1198_v49 = vrot.slane %v1196_v32, 5  ;;  %v1337_v37 = vunpack.c.l.b16 %v1327_v15 }
  0x8a   : > { %v1184_v42 = vrot.slane %v1182_v25, 5 }
  0x8b   : > { %1690 = vmatmul.msk.bf16.gmra.mxu2 %vm361_vm3, %v1680_v33  ;;  %v1212_v33 = vunpack.c.l.b16 %v1163_v18  ;;  %v1199_v55 = vor.u32 %v1198_v49, %v1195_v48 }
  0x8c   : > { %v1185_v53 = vor.u32 %v1184_v42, %v1181_v41 }
  0x8d   : > { %v1218_v52 = vpack.c.b16 %v1213_v39, %v1212_v33  ;;  %v1200_v61 = vrot.slane %v1199_v55, 4 }
  0x8e   : > { %v1186_v26 = vrot.slane %v1185_v53, 4 }
  0x8f   : > { %v1205_v9 = vsel %vm2044_vm4, %v1200_v61, %v1204_v62 }
  0x90   : > { %v1191_v60 = vsel %vm2044_vm4, %v1186_v26, %v1190_v59  ;;  %v1215_v11 = vunpack.c.l.b16 %v1205_v9 }
  0x91   : > { %v1214_v0 = vunpack.c.l.b16 %v1191_v60 }
  0x92   : > { %1711 = vmatmul.msk.bf16.gmra.mxu3 %vm361_vm3, %v1217_v1  ;;  %v1720_v1 = vld [vmem:[%s2019_s19 + $0x40] sm:$0xe]  ;;  %s1443_s19 = scalar_lea.hbm %s2437_s3, %s1752_s10 }
  0x93   : > { %v1728_v4 = vrot.slane %v1720_v1, 9  ;;  %v1219_v17 = vpack.c.b16 %v1215_v11, %v1214_v0  ;;  %s1446_s23 = sshll.u32 %s1443_s19, 4  ;;  %s1447_s23 = int_to_ptr.hbm [resolvable:$true] %s1446_s23 }
  0x94   : > { %s1852_s26 = sshra.s32 %s1447_s23, 4  ;;  %s1853_s26 = int_to_ptr.hbm [resolvable:$true] %s1852_s26 }
  0x95   : > { %v1323_v14 = vsel %vm2078_vm7, %v1728_v4, %v1322_v7  ;;  %s1854_s27 = scalar_lea.hbm %s1853_s26, 32  ;;  %p1859_p1 = scmp.lt.s32.totalorder %s1853_s26, %s2437_s3 }
  0x96   : > { %1732 = vmatmul.msk.bf16.gmra.mxu0 %vm361_vm3, %v1339_v8  ;;  %v1688_v8 = vor.u32 %v1751_v13, %v1687_v3  ;;  %v1336_v18 = vunpack.c.l.b16 %v1323_v14  ;;  %p1855_p12 = scmp.ne.s32.totalorder %s1853_s26, %s1854_s27  ;;  %p1860_p2 = scmp.lt.s32.totalorder %s1858_s30, %s1854_s27 }
  0x98   : > { %1662 = vmatmul.msk.bf16.gmra.mxu1 %vm361_vm3, %v941_v16  ;;  %v1341_v20 = vpack.c.b16 %v1337_v37, %v1336_v18  ;;  %p1856_p13 = pnand %p1855_p12, %p1980_p4  ;;  %p1861_p3 = por %p1860_p2, %p1859_p1 }
  0x9a   : > { %p1857_p0 = pneg %p1856_p13 }
  0x9b   : > { %1691 = vmatmul.msk.bf16.gmra.mxu2 %vm361_vm3, %v1684_v22 }
  0x9c   : > { %p1862_p5 = pnand %p1861_p3, %p1857_p0 }
  0xa2   : > { %1712 = vmatmul.msk.bf16.gmra.mxu3 %vm361_vm3, %v1218_v52 }
  0xa5   : > { %v392_v6 = vpop.f32.mrf.mxu1 }
  0xa6   : > { %1733 = vmatmul.msk.bf16.gmra.mxu0 %vm361_vm3, %v1340_v47 }
  0xa8   : > { %1663 = vmatmul.msk.bf16.gmra.mxu1 %vm361_vm3, %v942_v2 }
  0xab   : > { %1692 = vmatmul.msk.bf16.gmra.mxu2 %vm361_vm3, %v1688_v8 }
  0xad   : > { %v2332_v16 = vpop.f32.mrf.mxu1 }
  0xae   : > { %v397_v19 = vpop.f32.mrf.mxu2 }
  0xb2   : > { %1713 = vmatmul.msk.bf16.gmra.mxu3 %vm361_vm3, %v1219_v17 }
  0xb3   : > { %v387_v21 = vpop.f32.mrf.mxu0 }
  0xb5   : > { %v402_v22 = vpop.f32.mrf.mxu3  ;;  %v451_v23 = vpop.f32.mrf.mxu1 }
  0xb6   : > { %1734 = vmatmul.msk.bf16.gmra.mxu0 %vm361_vm3, %v1341_v20  ;;  %v2336_v46 = vpop.f32.mrf.mxu2  ;;  %v452_v24 = vadd.f32 %v451_v23, %v387_v21 }
  0xbb   : > { %v389_v25 = vpop.f32.mrf.mxu0 }
  0xbd   : > { %v2338_v44 = vpop.f32.mrf.mxu3  ;;  %v453_v54 = vpop.f32.mrf.mxu1 }
  0xbe   : > { %v568_v30 = vpop.f32.mrf.mxu2  ;;  %v454_v10 = vadd.f32 %v453_v54, %v389_v25 }
  0xbf   : > { %v588_v31 = vadd.f32 %v568_v30, %v452_v24 }
  0xc3   : > { %v845_v32 = vpop.f32.mrf.mxu0 }
  0xc5   : > { %v651_v33 = vpop.f32.mrf.mxu3  ;;  %v456_v34 = vpop.f32.mrf.mxu1 }
  0xc6   : > { %v671_v35 = vadd.f32 %v651_v33, %v588_v31  ;;  %v570_v36 = vpop.f32.mrf.mxu2  ;;  %v457_v38 = vadd.f32 %v456_v34, %v392_v6  ;;  %v2364_v33 = vld [vmem:[%s2436_s2] ss:$0 sm:$0xff] }
  0xc7   : > { %v589_v14 = vadd.f32 %v570_v36, %v454_v10 }
  0xc8   : > { %v865_v39 = vadd.f32 %v845_v32, %v671_v35 }
  0xcb   : > { %v847_v40 = vpop.f32.mrf.mxu0 }
  0xcd   : > { %v653_v41 = vpop.f32.mrf.mxu3  ;;  %v458_v42 = vpop.f32.mrf.mxu1 }
  0xce   : > { %v573_v43 = vpop.f32.mrf.mxu2  ;;  %v672_v17 = vadd.f32 %v653_v41, %v589_v14  ;;  %v459_v25 = vadd.f32 %v458_v42, %v2332_v16 }
  0xcf   : > { %v590_v45 = vadd.f32 %v573_v43, %v457_v38 }
  0xd3   : > { %v850_v48 = vpop.f32.mrf.mxu0 }
  0xd5   : > { %v656_v49 = vpop.f32.mrf.mxu3  ;;  %v461_v50 = vpop.f32.mrf.mxu1 }
  0xd6   : > { %v673_v51 = vadd.f32 %v656_v49, %v590_v45  ;;  %v575_v27 = vpop.f32.mrf.mxu2  ;;  %v462_v28 = vadd.f32 %v461_v50, %v397_v19 }
  0xd7   : > { %v591_v36 = vadd.f32 %v575_v27, %v459_v25 }
  0xd8   : > { %v867_v52 = vadd.f32 %v850_v48, %v673_v51 }
  0xdb   : > { %v852_v29 = vpop.f32.mrf.mxu0 }
  0xdd   : > { %v658_v53 = vpop.f32.mrf.mxu3  ;;  %v2340_v12 = vpop.f32.mrf.mxu1 }
  0xde   : > { %v578_v55 = vpop.f32.mrf.mxu2  ;;  %v674_v43 = vadd.f32 %v658_v53, %v591_v36 }
  0xdf   : > { %v592_v56 = vadd.f32 %v578_v55, %v462_v28 }
  0xe0   : > { %v868_v55 = vadd.f32 %v852_v29, %v674_v43 }
  0xe3   : > { %v855_v57 = vpop.f32.mrf.mxu0 }
  0xe5   : > { %v661_v58 = vpop.f32.mrf.mxu3  ;;  %v466_v47 = vpop.f32.mrf.mxu1 }
  0xe6   : > { %v675_v26 = vadd.f32 %v661_v58, %v592_v56  ;;  %v2342_v59 = vpop.f32.mrf.mxu2  ;;  %v467_v61 = vadd.f32 %v466_v47, %v402_v22  ;;  %v866_v22 = vadd.f32 %v847_v40, %v672_v17 }
  0xe8   : > { %v2344_v62 = vadd.f32 %v855_v57, %v675_v26 }
  0xeb   : > { %v2346_v1 = vpop.f32.mrf.mxu0 }
  0xed   : > { %v2348_v2 = vpop.f32.mrf.mxu3  ;;  %v2350_v3 = vpop.f32.mrf.mxu1 }
  0xee   : > { %v583_v13 = vpop.f32.mrf.mxu2 }
  0xef   : > { %v594_v5 = vadd.f32 %v583_v13, %v467_v61 }
  0xf3   : > { %v860_v6 = vpop.f32.mrf.mxu0 }
  0xf5   : > { %v666_v60 = vpop.f32.mrf.mxu3  ;;  %v967_v4 = vpop.f32.mrf.mxu1 }
  0xf6   : > { %v677_v7 = vadd.f32 %v666_v60, %v594_v5  ;;  %v2352_v8 = vpop.f32.mrf.mxu2  ;;  %v987_v18 = vadd.f32 %v967_v4, %v865_v39 }
  0xf8   : > { %v2354_v9 = vadd.f32 %v860_v6, %v677_v7 }
  0xfb   : > { %v2356_v63 = vpop.f32.mrf.mxu0 }
  0xfd   : > { %v2358_v0 = vpop.f32.mrf.mxu3  ;;  %v969_v11 = vpop.f32.mrf.mxu1 }
  0xfe   : > { %v1050_v15 = vpop.f32.mrf.mxu2  ;;  %v988_v30 = vadd.f32 %v969_v11, %v866_v22 }
  0xff   : > { %v1070_v19 = vadd.f32 %v1050_v15, %v987_v18 }
 0x103   : > { %v1366_v37 = vpop.f32.mrf.mxu0 }
 0x105   : > { %v1244_v20 = vpop.f32.mrf.mxu3  ;;  %v972_v21 = vpop.f32.mrf.mxu1 }
 0x106   : > { %v1052_v23 = vpop.f32.mrf.mxu2  ;;  %v1264_v24 = vadd.f32 %v1244_v20, %v1070_v19  ;;  %v989_v42 = vadd.f32 %v972_v21, %v867_v52  ;;  %v464_v52 = vadd.f32 %v2340_v12, %v2336_v46 }
 0x107   : > { %v1071_v31 = vadd.f32 %v1052_v23, %v988_v30 }
 0x108   : > { %v1386_v54 = vadd.f32 %v1366_v37, %v1264_v24  ;;  %v593_v13 = vadd.f32 %v2342_v59, %v464_v52 }
 0x10a   : > { %v1398_v40 = vadd.f32 %v2364_v33, %v1386_v54  ;;  %v676_v7 = vadd.f32 %v2348_v2, %v593_v13  ;;  %v469_v2 = vadd.f32 %v2350_v3, %v2338_v44 }
 0x10b   : > { %v1368_v32 = vpop.f32.mrf.mxu0 }
 0x10c   : > { %v1406_v48 = vmax.f32 %v1398_v40, 0.0  ;;  %v870_v59 = vadd.f32 %v2346_v1, %v676_v7  ;;  %v595_v30 = vadd.f32 %v2352_v8, %v469_v2 }
 0x10d   : > { %v1246_v34 = vpop.f32.mrf.mxu3  ;;  %v974_v35 = vpop.f32.mrf.mxu1 }
 0x10e   : > { %v1265_v38 = vadd.f32 %v1246_v34, %v1071_v31  ;;  %v1055_v39 = vpop.f32.mrf.mxu2  ;;  %v990_v53 = vadd.f32 %v974_v35, %v868_v55  ;;  %v678_v54 = vadd.f32 %v2358_v0, %v595_v30 }
 0x10f   : > { %v1072_v50 = vadd.f32 %v1055_v39, %v989_v42 }
 0x110   : > { %v1387_v41 = vadd.f32 %v1368_v32, %v1265_v38 }
 0x112   : > { %v1399_v16 = vadd.f32 %v2364_v33, %v1387_v41  ;;  %v872_v41 = vadd.f32 %v2356_v63, %v678_v54 }
 0x113   : > { %v1371_v45 = vpop.f32.mrf.mxu0 }
 0x114   : > { %v1407_v49 = vmax.f32 %v1399_v16, 0.0 }
 0x115   : > { %v1249_v51 = vpop.f32.mrf.mxu3  ;;  %v977_v56 = vpop.f32.mrf.mxu1 }
 0x116   : > { %v1756_v28 = vpack.c.bf16 %v1407_v49, %v1406_v48  ;;  %v1057_v27 = vpop.f32.mrf.mxu2  ;;  %v1266_v57 = vadd.f32 %v1249_v51, %v1072_v50  ;;  %v991_v11 = vadd.f32 %v977_v56, %v2344_v62 }
 0x117   : > { %v1073_v58 = vadd.f32 %v1057_v27, %v990_v53 }
 0x118   : > { %1757 = vst [vmem:[%s2371_s9] sm:$0xff] %v1756_v28   ;;  %v1388_v26 = vadd.f32 %v1371_v45, %v1266_v57 }
 0x11a   : > { %v1400_v6 = vadd.f32 %v2364_v33, %v1388_v26 }
 0x11b   : > { %v1373_v47 = vpop.f32.mrf.mxu0 }
 0x11c   : > { %v1408_v15 = vmax.f32 %v1400_v6, 0.0 }
 0x11d   : > { %v1251_v61 = vpop.f32.mrf.mxu3  ;;  %v979_v4 = vpop.f32.mrf.mxu1 }
 0x11e   : > { %v1267_v5 = vadd.f32 %v1251_v61, %v1073_v58  ;;  %v1060_v29 = vpop.f32.mrf.mxu2  ;;  %v992_v20 = vadd.f32 %v979_v4, %v870_v59 }
 0x11f   : > { %v1074_v12 = vadd.f32 %v1060_v29, %v991_v11 }
 0x120   : > { %v1389_v60 = vadd.f32 %v1373_v47, %v1267_v5 }
 0x122   : > { %v1401_v10 = vadd.f32 %v2364_v33, %v1389_v60 }
 0x123   : > { %v1376_v14 = vpop.f32.mrf.mxu0 }
 0x124   : > { %v1409_v46 = vmax.f32 %v1401_v10, 0.0 }
 0x125   : > { %v1254_v17 = vpop.f32.mrf.mxu3  ;;  %v982_v22 = vpop.f32.mrf.mxu1 }
 0x126   : > { %v1761_v18 = vpack.c.bf16 %v1409_v46, %v1408_v15  ;;  %v1062_v37 = vpop.f32.mrf.mxu2  ;;  %v1268_v19 = vadd.f32 %v1254_v17, %v1074_v12  ;;  %v993_v35 = vadd.f32 %v982_v22, %v2354_v9 }
 0x127   : > { %v1075_v21 = vadd.f32 %v1062_v37, %v992_v20 }
 0x128   : > { %1773 = vst [vmem:[%s2371_s9 + $0x8] sm:$0xff] %v1761_v18   ;;  %v1390_v24 = vadd.f32 %v1376_v14, %v1268_v19 }
 0x12a   : > { %v1402_v25 = vadd.f32 %v2364_v33, %v1390_v24 }
 0x12b   : > { %v1378_v23 = vpop.f32.mrf.mxu0 }
 0x12c   : > { %v1410_v36 = vmax.f32 %v1402_v25, 0.0 }
 0x12d   : > { %v1256_v62 = vpop.f32.mrf.mxu3  ;;  %v984_v3 = vpop.f32.mrf.mxu1 }
 0x12e   : > { %v1269_v31 = vadd.f32 %v1256_v62, %v1075_v21  ;;  %v1065_v32 = vpop.f32.mrf.mxu2  ;;  %v994_v42 = vadd.f32 %v984_v3, %v872_v41 }
 0x12f   : > { %v1076_v44 = vadd.f32 %v1065_v32, %v993_v35 }
 0x130   : > { %v1391_v1 = vadd.f32 %v1378_v23, %v1269_v31 }
 0x132   : > { %v1403_v34 = vadd.f32 %v2364_v33, %v1391_v1 }
 0x133   : > { %v1381_v39 = vpop.f32.mrf.mxu0 }
 0x134   : > { %v1411_v38 = vmax.f32 %v1403_v34, 0.0 }
 0x135   : > { %v1259_v40 = vpop.f32.mrf.mxu3 }
 0x136   : > { %v1766_v8 = vpack.c.bf16 %v1411_v38, %v1410_v36  ;;  %v1067_v43 = vpop.f32.mrf.mxu2  ;;  %v1270_v16 = vadd.f32 %v1259_v40, %v1076_v44 }
 0x137   : > { %v1077_v0 = vadd.f32 %v1067_v43, %v994_v42 }
 0x138   : > { %1774 = vst [vmem:[%s2371_s9 + $0x10] sm:$0xff] %v1766_v8   ;;  %v1392_v45 = vadd.f32 %v1381_v39, %v1270_v16 }
 0x13a   : > { %v1404_v50 = vadd.f32 %v2364_v33, %v1392_v45 }
 0x13b   : > { %v1383_v49 = vpop.f32.mrf.mxu0 }
 0x13c   : > { %v1412_v28 = vmax.f32 %v1404_v50, 0.0 }
 0x13d   : > { %v1261_v48 = vpop.f32.mrf.mxu3 }
 0x13e   : > { %v1271_v9 = vadd.f32 %v1261_v48, %v1077_v0 }
 0x140   : > { %v1393_v51 = vadd.f32 %v1383_v49, %v1271_v9 }
 0x142   : > { %v1405_v63 = vadd.f32 %v2364_v33, %v1393_v51 }
 0x144   : > { %v1413_v55 = vmax.f32 %v1405_v63, 0.0 }
 0x146   : > { %v1771_v27 = vpack.c.bf16 %v1413_v55, %v1412_v28 }
 0x148   : > { %1775 = vst [vmem:[%s2371_s9 + $0x18] sm:$0xff] %v1771_v27  }
 0x149   : > { %1865 = shalt.err (!%p1862_p5)
}
 0x14a   : > { %s1918_s6 = smov 64   ;;  %s1919_s7 = smov 4  }
 0x14b   : > { %1780 = dma.vmem_to_hbm [thread:$0]  (%p1980_p4), %s1445_s21, 512, %s1447_s23, %s1431_s15, %s1918_s6, %s1918_s6, %s1919_s7  }
 0x14c PF: > { %p1786_p6 = scmp.ge.s32.totalorder %s1916_s17, 2  ;;  %s1461_s8 = sand.u32 1, %s1896_s12  }
 0x14d   : > { %s1462_s9 = scalar_lea.sflag [#allocation3], %s1461_s8 }
 0x14e   : > { %p1783_p7 = pnand %p1786_p6, %p1987_p8 }
 0x150   : > { %p1784_p9 = pneg %p1783_p7 }
 0x152   : > { %1891 = dma.done.wait (%p1784_p9), %s1462_s9, 512  }
 0x153   : > { %1893 = vsyncadd (%p1784_p9), %s1462_s9, 4294966784  ;;  %s16_s17 = sadd.s32 1, %s1916_s17   ;;  %s2444_s12 = smov %s1900_s13 }
 0x154   : > { %p13_p10 = scmp.ge.s32.totalorder %s16_s17, 4   ;;  %s2445_s13 = smov %s1904_s14 }
 0x155   : > { %s2446_s14 = smov %s1993_s25  ;;  %s2447_s15 = smov %s1912_s16 }
 0x156   : > { %s2448_s16 = smov %s2450_s20  ;;  %15 = sbr.rel (!%p13_p10) target bundleno = 4 (0x4), region = 83 }
 0x15b   :  { %1468 = vsyncpa [#allocation3], 1 }
 0x15c   :  { %1470 = vsyncpa [#allocation3 + $0x1], 1 }

</bundles_post_ra>
